<compile_context>
chip_gen: v6e
topology: v6e:2x2x1
jax: 0.10.0
libtpu: 0.0.40
codegen_flags: <defaults>
</compile_context>

<pallas_src>
import jax
import jax.numpy as jnp
from jax.experimental import pallas as pl
from jax.experimental.pallas import tpu as pltpu

_LANE = 128
_SUBLANE_ALIGN = 32                 # covers f32(8) / bf16(16) / int8+fp8(32) packing
_TARGET_BLOCK_BYTES = 4 << 20       # ~4 MiB per block: measured roofline plateau


def _exp_kernel(x_ref, o_ref):
    # One transcendental per element -> EUP slot; everything else is DMA.
    o_ref[...] = jnp.exp(x_ref[...])


def _round_up(a, m):
    return ((a + m - 1) // m) * m


def _pick_lane_width(n_elems):
    """Widest power-of-two lane dim (128..2048) dividing n_elems with >=8 rows."""
    for w in (2048, 1024, 512, 256, 128):
        if n_elems % w == 0 and n_elems // w >= 8:
            return w
    return _LANE


def _exp_2d(x2d):
    """Run the exp kernel over a lane-dense (rows, lane_w) slab."""
    rows, lane_w = x2d.shape
    itemsize = jnp.dtype(x2d.dtype).itemsize
    target_rows = max(_SUBLANE_ALIGN, (_TARGET_BLOCK_BYTES // itemsize) // lane_w)

    if rows > target_rows:
        block_rows = target_rows
    elif rows >= 2 * _SUBLANE_ALIGN:
        # Whole tensor fits one block: still split in two so both of v7x's
        # TensorCores get work (measured-neutral on single-TC v5e/v6e).
        block_rows = _round_up(pl.cdiv(rows, 2), _SUBLANE_ALIGN)
    else:
        block_rows = rows           # full extent: exempt from (8,128) tiling rule

    grid = (pl.cdiv(rows, block_rows),)
    n_elems = rows * lane_w
    return pl.pallas_call(
        _exp_kernel,
        out_shape=jax.ShapeDtypeStruct((rows, lane_w), x2d.dtype),
        grid_spec=pltpu.PrefetchScalarGridSpec(
            num_scalar_prefetch=0,
            grid=grid,
            in_specs=[pl.BlockSpec((block_rows, lane_w), lambda i: (i, 0))],
            out_specs=pl.BlockSpec((block_rows, lane_w), lambda i: (i, 0)),
        ),
        compiler_params=pltpu.CompilerParams(
            dimension_semantics=("parallel",),   # shard blocks across v7x's 2 TCs
            vmem_limit_bytes=48 << 20,           # ~4 MiB blocks: fits v7x's 64 MiB
        ),
        cost_estimate=pl.CostEstimate(
            flops=0,
            transcendentals=n_elems,
            bytes_accessed=2 * n_elems * itemsize,
        ),
    )(x2d)


def exp(x):
    """Elementwise exp as a Pallas TPU kernel (semantics of torch.Tensor.exp)."""
    if x.size == 0:
        return jnp.exp(x)
    if not jnp.issubdtype(x.dtype, jnp.floating):
        # torch promotes integer inputs to float for exp()
        x = x.astype(jnp.float32)

    orig_shape = x.shape
    flat = x.reshape(-1)
    n = flat.shape[0]

    rem = n % _LANE
    n_main = n - rem
    if n_main == 0:
        # Tiny (<128 elements): a kernel launch is pure overhead.
        return jnp.exp(x)

    lane_w = _pick_lane_width(n_main)
    if rem == 0:
        # Aligned: reshape is free; no pad, no slice, single HBM read + write.
        y2d = _exp_2d(flat.reshape(n_main // lane_w, lane_w))
        return y2d.reshape(orig_shape)

    # 128-unaligned: kernel on the aligned prefix, plain exp on the <128-elem
    # tail — avoids the full-tensor pad/slice round-trip of the old version.
    main = _exp_2d(flat[:n_main].reshape(n_main // lane_w, lane_w)).reshape(-1)
    tail = jnp.exp(flat[n_main:])
    return jnp.concatenate([main, tail]).reshape(orig_shape)


if __name__ == "__main__":
    key = jax.random.PRNGKey(0)

    # NCHW input, matching typical conv activations (aligned fast path).
    x = jax.random.normal(key, (2, 4, 16, 16), dtype=jnp.float32) * 3.0
    y = exp(x)
    jax.block_until_ready(y)
    assert y.shape == x.shape and y.dtype == x.dtype
    assert jnp.allclose(y, jnp.exp(x), atol=1e-5, rtol=1e-5), "mismatch vs reference"

    # Tiny 128-unaligned input (<128 elements -> pure jnp.exp fallback).
    x2 = jax.random.normal(jax.random.PRNGKey(1), (3, 5, 7), dtype=jnp.float32)
    y2 = exp(x2)
    jax.block_until_ready(y2)
    assert jnp.allclose(y2, jnp.exp(x2), atol=1e-5, rtol=1e-5), "tiny tail mismatch"

    # Larger 128-unaligned input: exercises aligned-prefix kernel + tail path.
    x3 = jax.random.normal(jax.random.PRNGKey(2), (1000,), dtype=jnp.float32)
    y3 = exp(x3)
    jax.block_until_ready(y3)
    assert jnp.allclose(y3, jnp.exp(x3), atol=1e-5, rtol=1e-5), "prefix/tail mismatch"

    print("KERNEL_OK")
</pallas_src>

<mosaic_0001>
module attributes {stable_mosaic.version = 11 : i64} {
  func.func @_exp_kernel(%arg0: i32, %arg1: memref<8x256xf32, #tpu.memory_space<vmem>>, %arg2: memref<8x256xf32, #tpu.memory_space<vmem>>) attributes {dimension_semantics = [#tpu.dimension_semantics<parallel>], iteration_bounds = array<i64: 1>, scalar_prefetch = 0 : i64, scratch_operands = 0 : i64, tpu.core_type = #tpu.core_type<tc>, window_params = [{transform_indices = @transform_0, window_bounds = array<i64: 8, 256>}, {transform_indices = @transform_1, window_bounds = array<i64: 8, 256>}]} {
    %c0 = arith.constant 0 : index
    %c0_0 = arith.constant 0 : index
    %0 = vector.load %arg1[%c0, %c0_0] : memref<8x256xf32, #tpu.memory_space<vmem>>, vector<8x256xf32>
    %1 = math.exp %0 : vector<8x256xf32>
    %c0_1 = arith.constant 0 : index
    %c0_2 = arith.constant 0 : index
    %2 = vector.load %arg2[%c0_1, %c0_2] : memref<8x256xf32, #tpu.memory_space<vmem>>, vector<8x256xf32>
    tpu.vector_store %arg2[%c0_1, %c0_2], %1 {strides = array<i32>} : memref<8x256xf32, #tpu.memory_space<vmem>>, vector<8x256xf32>,
    return
  }
  func.func @transform_0(%arg0: i32) -> (i32, i32) {
    %c0_i32 = arith.constant 0 : i32
    %c0_i32_0 = arith.constant 0 : i32
    return %arg0, %c0_i32 : i32, i32
  }
  func.func @transform_1(%arg0: i32) -> (i32, i32) {
    %c0_i32 = arith.constant 0 : i32
    %c0_i32_0 = arith.constant 0 : i32
    return %arg0, %c0_i32 : i32, i32
  }
}

</mosaic_0001>

<bundles_post_ra>
// kernel: tpu_custom_call.1
= control target key start
LH: loop header
LB: loop body
LE: loop exit
PB: predicated region body
PF: predicated region fallthrough
CT: control target
= control target key end

     0   :  { %6 = vsyncpa [#allocation3], 0  ;;  %s112_s0 = inlined_call_operand.hbm [shape: f32[8,256], index: 0, kind: input, shape index: {}]   ;;  %s113_s1 = inlined_call_operand.hbm [shape: f32[8,256], index: 1, kind: output, shape index: {}]  }
   0x1   :  { %7 = vsyncpa [#allocation4], 0  ;;  %s94_s6 = smov [#allocation2]  }
   0x2   :  { %s14_s7 = sshll.u32 %s94_s6, 4  ;;  %s15_s7 = int_to_ptr.vmem [resolvable:$true] %s14_s7 }
   0x3   :  { %s58_s8 = scalar_lea.vmem %s15_s7, 256  ;;  %p63_p1 = scmp.lt.s32.totalorder %s15_s7, %s15_s7 }
   0x4   :  { %p59_p0 = scmp.ne.s32.totalorder %s15_s7, %s58_s8  ;;  %p64_p2 = scmp.lt.s32.totalorder %s58_s8, %s58_s8 }
   0x6   :  { %p65_p3 = por %p64_p2, %p63_p1 }
   0x8   :  { %p66_p4 = pnand %p65_p3, %p59_p0 }
   0xa   :  { %69 = shalt.err (!%p66_p4)
}
   0xb   :  { %17 = dma.hbm_to_vmem [thread:$0]  %s112_s0, 256, %s15_s7, [#allocation3]  }
   0xc   :  { %90 = dma.done.wait [#allocation3], 256  }
   0xd   :  { %91 = vsyncadd [#allocation3], 4294967040  ;;  %v21_v0 = vld [vmem:[#allocation2] sm:$0xff]  ;;  %v22_v1 = vld [vmem:[#allocation2 + $0x8] sm:$0xff]  ;;  %s95_s11 = smov [#allocation5]  }
   0xe   :  { %v23_v2 = vmul.f32 1.442695, %v21_v0  ;;  %v25_v3 = vmul.f32 1.442695, %v22_v1  ;;  %s35_s12 = sshll.u32 %s95_s11, 4  ;;  %s36_s12 = int_to_ptr.vmem [resolvable:$true] %s35_s12 }
   0xf   :  { %s70_s13 = scalar_lea.vmem %s36_s12, 256  ;;  %p75_p6 = scmp.lt.s32.totalorder %s36_s12, %s36_s12 }
  0x10   :  { %46 = vpow2.f32 %v23_v2  ;;  %p71_p5 = scmp.ne.s32.totalorder %s36_s12, %s70_s13  ;;  %p76_p7 = scmp.lt.s32.totalorder %s70_s13, %s70_s13 }
  0x11   :  { %48 = vpow2.f32 %v25_v3 }
  0x12   :  { %p77_p8 = por %p76_p7, %p75_p6 }
  0x14   :  { %p78_p9 = pnand %p77_p8, %p71_p5 }
  0x1d   :  { %v47_v4 = vpop.eup %46 }
  0x1e   :  { %v49_v5 = vpop.eup %48  ;;  %27 = vst [vmem:[#allocation5] sm:$0xff] %v47_v4 }
  0x1f   :  { %28 = vst [vmem:[#allocation5 + $0x8] sm:$0xff] %v49_v5 }
  0x20   :  { %81 = shalt.err (!%p78_p9)
}
  0x21   :  { %38 = dma.vmem_to_hbm [thread:$0]  %s36_s12, 256, %s113_s1, [#allocation4]  }
  0x22   :  { %92 = dma.done.wait [#allocation4], 256  }
  0x23   :  { %93 = vsyncadd [#allocation4], 4294967040 }
  0x24   :  { %42 = vsyncpa [#allocation3], 1 }
  0x25   :  { %43 = vsyncpa [#allocation4], 1 }

</bundles_post_ra>
